<compile_context>
chip_gen: v7x
topology: tpu7x:2x2x1
jax: 0.10.0
libtpu: 0.0.40
codegen_flags: <defaults>
</compile_context>

<pallas_src>
import functools

import jax
import jax.numpy as jnp
from jax.experimental import pallas as pl
from jax.experimental.pallas import tpu as pltpu


def resblock_kernel(x_ref, w1_ref, b1_ref, w2_ref, b2_ref, out_ref,
                    xext_ref, h1ext_ref, col_ref, *, H, W, C, K, res_scale):
    """One batch element per grid step, flat 'C x (H*W)' layout.

    x_ref    : (1, C, H*W)        input image (channels on sublanes, pixels on lanes)
    w1_ref   : (C, K*K*C)         conv1 weight, rows=Cout, cols ordered (kh, kw, cin)
    b1_ref   : (C, 1)             conv1 bias
    w2_ref   : (C, K*K*C)         conv2 weight
    b2_ref   : (C, 1)             conv2 bias
    out_ref  : (1, C, H*W)        output
    xext_ref : (C, H*W + 2*E)     flat input with zero halo of E = P*W + P columns
    h1ext_ref: (C, H*W + 2*E)     same for the conv1 activation
    col_ref  : (K*K*C, H*W)       im2col scratch (reused by both convs)
    """
    P = K // 2
    HW = H * W
    E = P * W + P            # halo width (flat columns) on each side
    f32 = jnp.float32

    # Column index of every flat pixel -> lane masks for horizontally shifted taps.
    col_pos = jax.lax.broadcasted_iota(jnp.int32, (C, HW), 1) % W
    masks = {}
    for dx in range(-P, P + 1):
        if dx != 0:
            masks[dx] = (col_pos >= max(0, -dx)) & (col_pos < W - max(0, dx))

    # Zero only the halo strips (interior is fully overwritten every step).
    # Cheap (2*E columns) and safe under megacore grid partitioning.
    if E > 0:
        zeros_halo = jnp.zeros((C, E), f32)
        xext_ref[:, 0:E] = zeros_halo
        xext_ref[:, E + HW:E + HW + E] = zeros_halo
        h1ext_ref[:, 0:E] = zeros_halo
        h1ext_ref[:, E + HW:E + HW + E] = zeros_halo

    def build_im2col(src_ref):
        # col_ref rows [(kh*K+kw)*C : +C] = src shifted by (kh-P, kw-P), zero outside.
        t = 0
        for kh in range(K):
            for kw in range(K):
                dy, dx = kh - P, kw - P
                s = E + dy * W + dx               # static, always in [0, 2*E]
                slab = src_ref[:, s:s + HW]
                if dx != 0:
                    slab = jnp.where(masks[dx], slab, 0.0)
                col_ref[t * C:(t + 1) * C, :] = slab
                t += 1

    # ---- conv1: single wide-contraction MXU matmul + bias + ReLU ----
    xf = x_ref[0].astype(f32)                      # (C, HW)
    xext_ref[:, E:E + HW] = xf
    build_im2col(xext_ref)
    # NOTE: on v6e/v7x casting the dot operands to bf16 (keeping f32 accumulation)
    # would double MXU throughput; kept f32 here to match the f32 reference.
    h1 = jnp.dot(w1_ref[...].astype(f32), col_ref[...],
                 preferred_element_type=f32)       # (C, HW)
    h1 = jnp.maximum(h1 + b1_ref[...].astype(f32), 0.0)

    # ---- conv2 + bias ----
    h1ext_ref[:, E:E + HW] = h1
    build_im2col(h1ext_ref)
    body = jnp.dot(w2_ref[...].astype(f32), col_ref[...],
                   preferred_element_type=f32)
    body = body + b2_ref[...].astype(f32)

    # ---- res_scale, residual add, final ReLU (spec forward returns F.relu(res)) ----
    out = jnp.maximum(body * res_scale + xf, 0.0)
    out_ref[...] = out.reshape(1, C, HW).astype(out_ref.dtype)


def resblock_pallas(x_nchw, w1, b1, w2, b2, res_scale=1.0):
    """x_nchw: (N, C, H, W).  w*: (K, K, Cin, Cout) HWIO.  b*: (C,)."""
    N, C, H, W = x_nchw.shape
    K = w1.shape[0]
    P = K // 2
    HW = H * W
    E = P * W + P

    # No transpose, no padding: NCHW flattens directly to the lane-dense layout.
    x_flat = x_nchw.reshape(N, C, HW)

    # Weights -> (Cout, K*K*Cin) with contraction index ordered (kh, kw, cin) to
    # match the im2col row order built inside the kernel.  Glue only.
    w1_mat = jnp.transpose(w1, (3, 0, 1, 2)).reshape(C, K * K * C)
    w2_mat = jnp.transpose(w2, (3, 0, 1, 2)).reshape(C, K * K * C)
    b1c = b1.reshape(C, 1)
    b2c = b2.reshape(C, 1)

    kernel = functools.partial(resblock_kernel, H=H, W=W, C=C, K=K,
                               res_scale=float(res_scale))

    # Advisory cost hint so XLA schedules surrounding ops around the custom call.
    flops = 2 * (2 * K * K * C * C * HW) * N
    bytes_accessed = 4 * (2 * N * C * HW + 2 * K * K * C * C + 2 * C)
    cost = pl.CostEstimate(flops=flops, transcendentals=0,
                           bytes_accessed=bytes_accessed)

    # TODO(synk): for large images (e.g. H=W>=256, C=64) add a row-tiled spatial grid
    # axis with halo'd blocks so per-step VMEM stays under v7x's 64 MiB limit and both
    # TensorCores get work even at small batch.
    out_flat = pl.pallas_call(
        kernel,
        out_shape=jax.ShapeDtypeStruct((N, C, HW), x_nchw.dtype),
        grid_spec=pltpu.PrefetchScalarGridSpec(
            num_scalar_prefetch=0,
            grid=(N,),
            in_specs=[
                pl.BlockSpec((1, C, HW), lambda n: (n, 0, 0)),
                pl.BlockSpec((C, K * K * C), lambda n: (0, 0)),
                pl.BlockSpec((C, 1), lambda n: (0, 0)),
                pl.BlockSpec((C, K * K * C), lambda n: (0, 0)),
                pl.BlockSpec((C, 1), lambda n: (0, 0)),
            ],
            out_specs=pl.BlockSpec((1, C, HW), lambda n: (n, 0, 0)),
            scratch_shapes=[
                pltpu.VMEM((C, HW + 2 * E), jnp.float32),
                pltpu.VMEM((C, HW + 2 * E), jnp.float32),
                pltpu.VMEM((K * K * C, HW), jnp.float32),
            ],
        ),
        compiler_params=pltpu.CompilerParams(dimension_semantics=("parallel",)),
        cost_estimate=cost,
    )(x_flat, w1_mat, b1c, w2_mat, b2c)

    return out_flat.reshape(N, C, H, W)


def resblock_ref(x_nchw, w1, b1, w2, b2, res_scale=1.0):
    """Pure-JAX reference (same math as the PyTorch module)."""
    x = jnp.transpose(x_nchw, (0, 2, 3, 1))
    dn = jax.lax.conv_dimension_numbers(x.shape, w1.shape, ('NHWC', 'HWIO', 'NHWC'))
    h = jax.lax.conv_general_dilated(x, w1, (1, 1), 'SAME', dimension_numbers=dn) + b1
    h = jnp.maximum(h, 0.0)
    h2 = jax.lax.conv_general_dilated(h, w2, (1, 1), 'SAME', dimension_numbers=dn) + b2
    out = jnp.maximum(h2 * res_scale + x, 0.0)
    return jnp.transpose(out, (0, 3, 1, 2))


if __name__ == "__main__":
    # Deterministic synthetic params (no checkpoint loading).
    # ResBlock(conv=default_conv, n_feats=4, kernel_size=3, bias=True, bn=False,
    #          act=ReLU, res_scale=1)
    N, C, H, W, K = 2, 4, 16, 16, 3
    key = jax.random.PRNGKey(0)
    k1, k2, k3, k4, k5 = jax.random.split(key, 5)
    x = jax.random.normal(k1, (N, C, H, W), jnp.float32)
    w1 = jax.random.normal(k2, (K, K, C, C), jnp.float32) * 0.1   # HWIO
    b1 = jax.random.normal(k3, (C,), jnp.float32) * 0.1
    w2 = jax.random.normal(k4, (K, K, C, C), jnp.float32) * 0.1   # HWIO
    b2 = jax.random.normal(k5, (C,), jnp.float32) * 0.1

    out = resblock_pallas(x, w1, b1, w2, b2, res_scale=1.0)
    jax.block_until_ready(out)

    ref = resblock_ref(x, w1, b1, w2, b2, res_scale=1.0)
    assert out.shape == (N, C, H, W) and out.dtype == jnp.float32
    assert jnp.allclose(out, ref, atol=1e-4, rtol=1e-4), float(
        jnp.max(jnp.abs(out - ref)))
    print("KERNEL_OK")
</pallas_src>

<mosaic_0001>
module attributes {stable_mosaic.version = 11 : i64} {
  func.func @resblock_kernel(%arg0: i32, %arg1: memref<1x4x256xf32, #tpu.memory_space<vmem>>, %arg2: memref<4x36xf32, #tpu.memory_space<vmem>>, %arg3: memref<4x1xf32, #tpu.memory_space<vmem>>, %arg4: memref<4x36xf32, #tpu.memory_space<vmem>>, %arg5: memref<4x1xf32, #tpu.memory_space<vmem>>, %arg6: memref<1x4x256xf32, #tpu.memory_space<vmem>>, %arg7: memref<4x290xf32, #tpu.memory_space<vmem>>, %arg8: memref<4x290xf32, #tpu.memory_space<vmem>>, %arg9: memref<36x256xf32, #tpu.memory_space<vmem>>) attributes {dimension_semantics = [#tpu.dimension_semantics<parallel>], iteration_bounds = array<i64: 2>, scalar_prefetch = 0 : i64, scratch_operands = 3 : i64, tpu.core_type = #tpu.core_type<tc>, window_params = [{transform_indices = @transform_0, window_bounds = array<i64: 1, 4, 256>}, {pipeline_mode = #tpu.pipeline_mode<synchronous>, transform_indices = @transform_1, window_bounds = array<i64: 4, 36>}, {pipeline_mode = #tpu.pipeline_mode<synchronous>, transform_indices = @transform_2, window_bounds = array<i64: 4, 1>}, {pipeline_mode = #tpu.pipeline_mode<synchronous>, transform_indices = @transform_3, window_bounds = array<i64: 4, 36>}, {pipeline_mode = #tpu.pipeline_mode<synchronous>, transform_indices = @transform_4, window_bounds = array<i64: 4, 1>}, {transform_indices = @transform_5, window_bounds = array<i64: 1, 4, 256>}]} {
    %0 = tpu.iota {dimensions = array<i32: 1>} : vector<4x256xi32>
    %c16_i32 = arith.constant 16 : i32
    %c0_i32 = arith.constant 0 : i32
    %1 = arith.cmpi eq, %c16_i32, %c0_i32 : i32
    %c1_i32 = arith.constant 1 : i32
    %2 = arith.select %1, %c1_i32, %c16_i32 : i32
    %3 = vector.broadcast %2 : i32 to vector<4x256xi32>
    %4 = arith.remsi %0, %3 : vector<4x256xi32>
    %c0_i32_0 = arith.constant 0 : i32
    %5 = vector.broadcast %c0_i32_0 : i32 to vector<4x256xi32>
    %6 = arith.cmpi ne, %4, %5 : vector<4x256xi32>
    %c0_i32_1 = arith.constant 0 : i32
    %7 = vector.broadcast %c0_i32_1 : i32 to vector<4x256xi32>
    %8 = arith.cmpi slt, %4, %7 : vector<4x256xi32>
    %c0_i32_2 = arith.constant 0 : i32
    %9 = arith.cmpi slt, %2, %c0_i32_2 : i32
    %10 = vector.broadcast %9 : i1 to vector<4x256xi1>
    %11 = vector.broadcast %10 : vector<4x256xi1> to vector<4x256xi1>
    %12 = arith.xori %8, %11 : vector<4x256xi1>
    %13 = arith.andi %12, %6 : vector<4x256xi1>
    %14 = vector.broadcast %2 : i32 to vector<4x256xi32>
    %15 = arith.addi %4, %14 : vector<4x256xi32>
    %16 = arith.select %13, %15, %4 : vector<4x256xi1>, vector<4x256xi32>
    %c1_i32_3 = arith.constant 1 : i32
    %17 = vector.broadcast %c1_i32_3 : i32 to vector<4x256xi32>
    %18 = arith.cmpi sge, %16, %17 : vector<4x256xi32>
    %c16_i32_4 = arith.constant 16 : i32
    %19 = vector.broadcast %c16_i32_4 : i32 to vector<4x256xi32>
    %20 = arith.cmpi slt, %16, %19 : vector<4x256xi32>
    %21 = arith.andi %18, %20 : vector<4x256xi1>
    %c0_i32_5 = arith.constant 0 : i32
    %22 = vector.broadcast %c0_i32_5 : i32 to vector<4x256xi32>
    %23 = arith.cmpi sge, %16, %22 : vector<4x256xi32>
    %c15_i32 = arith.constant 15 : i32
    %24 = vector.broadcast %c15_i32 : i32 to vector<4x256xi32>
    %25 = arith.cmpi slt, %16, %24 : vector<4x256xi32>
    %26 = arith.andi %23, %25 : vector<4x256xi1>
    %cst = arith.constant 0.000000e+00 : f32
    %27 = vector.broadcast %cst : f32 to vector<4x17xf32>
    %c0 = arith.constant 0 : index
    %c0_6 = arith.constant 0 : index
    %28 = vector.load %arg7[%c0, %c0_6] : memref<4x290xf32, #tpu.memory_space<vmem>>, vector<4x17xf32>
    tpu.vector_store %arg7[%c0, %c0_6], %27 {strides = array<i32>} : memref<4x290xf32, #tpu.memory_space<vmem>>, vector<4x17xf32>,
    %c0_7 = arith.constant 0 : index
    %c273 = arith.constant 273 : index
    %29 = vector.load %arg7[%c0_7, %c273] : memref<4x290xf32, #tpu.memory_space<vmem>>, vector<4x17xf32>
    tpu.vector_store %arg7[%c0_7, %c273], %27 {strides = array<i32>} : memref<4x290xf32, #tpu.memory_space<vmem>>, vector<4x17xf32>,
    %c0_8 = arith.constant 0 : index
    %c0_9 = arith.constant 0 : index
    %30 = vector.load %arg8[%c0_8, %c0_9] : memref<4x290xf32, #tpu.memory_space<vmem>>, vector<4x17xf32>
    tpu.vector_store %arg8[%c0_8, %c0_9], %27 {strides = array<i32>} : memref<4x290xf32, #tpu.memory_space<vmem>>, vector<4x17xf32>,
    %c0_10 = arith.constant 0 : index
    %c273_11 = arith.constant 273 : index
    %31 = vector.load %arg8[%c0_10, %c273_11] : memref<4x290xf32, #tpu.memory_space<vmem>>, vector<4x17xf32>
    tpu.vector_store %arg8[%c0_10, %c273_11], %27 {strides = array<i32>} : memref<4x290xf32, #tpu.memory_space<vmem>>, vector<4x17xf32>,
    %c0_12 = arith.constant 0 : index
    %c0_13 = arith.constant 0 : index
    %c0_14 = arith.constant 0 : index
    %32 = vector.load %arg1[%c0_12, %c0_13, %c0_14] : memref<1x4x256xf32, #tpu.memory_space<vmem>>, vector<1x4x256xf32>
    %33 = vector.shape_cast %32 : vector<1x4x256xf32> to vector<4x256xf32>
    %c0_15 = arith.constant 0 : index
    %c17 = arith.constant 17 : index
    %34 = vector.load %arg7[%c0_15, %c17] : memref<4x290xf32, #tpu.memory_space<vmem>>, vector<4x256xf32>
    tpu.vector_store %arg7[%c0_15, %c17], %33 {strides = array<i32>} : memref<4x290xf32, #tpu.memory_space<vmem>>, vector<4x256xf32>,
    %c0_16 = arith.constant 0 : index
    %c0_17 = arith.constant 0 : index
    %35 = vector.load %arg7[%c0_16, %c0_17] : memref<4x290xf32, #tpu.memory_space<vmem>>, vector<4x256xf32>
    %cst_18 = arith.constant 0.000000e+00 : f32
    %36 = vector.broadcast %cst_18 : f32 to vector<4x256xf32>
    %37 = arith.select %21, %35, %36 : vector<4x256xi1>, vector<4x256xf32>
    %c0_19 = arith.constant 0 : index
    %c0_20 = arith.constant 0 : index
    %38 = vector.load %arg9[%c0_19, %c0_20] : memref<36x256xf32, #tpu.memory_space<vmem>>, vector<4x256xf32>
    tpu.vector_store %arg9[%c0_19, %c0_20], %37 {strides = array<i32>} : memref<36x256xf32, #tpu.memory_space<vmem>>, vector<4x256xf32>,
    %c0_21 = arith.constant 0 : index
    %c1 = arith.constant 1 : index
    %39 = vector.load %arg7[%c0_21, %c1] : memref<4x290xf32, #tpu.memory_space<vmem>>, vector<4x256xf32>
    %c4 = arith.constant 4 : index
    %c0_22 = arith.constant 0 : index
    %40 = vector.load %arg9[%c4, %c0_22] : memref<36x256xf32, #tpu.memory_space<vmem>>, vector<4x256xf32>
    tpu.vector_store %arg9[%c4, %c0_22], %39 {strides = array<i32>} : memref<36x256xf32, #tpu.memory_space<vmem>>, vector<4x256xf32>,
    %c0_23 = arith.constant 0 : index
    %c2 = arith.constant 2 : index
    %41 = vector.load %arg7[%c0_23, %c2] : memref<4x290xf32, #tpu.memory_space<vmem>>, vector<4x256xf32>
    %cst_24 = arith.constant 0.000000e+00 : f32
    %42 = vector.broadcast %cst_24 : f32 to vector<4x256xf32>
    %43 = arith.select %26, %41, %42 : vector<4x256xi1>, vector<4x256xf32>
    %c8 = arith.constant 8 : index
    %c0_25 = arith.constant 0 : index
    %44 = vector.load %arg9[%c8, %c0_25] : memref<36x256xf32, #tpu.memory_space<vmem>>, vector<4x256xf32>
    tpu.vector_store %arg9[%c8, %c0_25], %43 {strides = array<i32>} : memref<36x256xf32, #tpu.memory_space<vmem>>, vector<4x256xf32>,
    %c0_26 = arith.constant 0 : index
    %c16 = arith.constant 16 : index
    %45 = vector.load %arg7[%c0_26, %c16] : memref<4x290xf32, #tpu.memory_space<vmem>>, vector<4x256xf32>
    %cst_27 = arith.constant 0.000000e+00 : f32
    %46 = vector.broadcast %cst_27 : f32 to vector<4x256xf32>
    %47 = arith.select %21, %45, %46 : vector<4x256xi1>, vector<4x256xf32>
    %c12 = arith.constant 12 : index
    %c0_28 = arith.constant 0 : index
    %48 = vector.load %arg9[%c12, %c0_28] : memref<36x256xf32, #tpu.memory_space<vmem>>, vector<4x256xf32>
    tpu.vector_store %arg9[%c12, %c0_28], %47 {strides = array<i32>} : memref<36x256xf32, #tpu.memory_space<vmem>>, vector<4x256xf32>,
    %c0_29 = arith.constant 0 : index
    %c17_30 = arith.constant 17 : index
    %49 = vector.load %arg7[%c0_29, %c17_30] : memref<4x290xf32, #tpu.memory_space<vmem>>, vector<4x256xf32>
    %c16_31 = arith.constant 16 : index
    %c0_32 = arith.constant 0 : index
    %50 = vector.load %arg9[%c16_31, %c0_32] : memref<36x256xf32, #tpu.memory_space<vmem>>, vector<4x256xf32>
    tpu.vector_store %arg9[%c16_31, %c0_32], %49 {strides = array<i32>} : memref<36x256xf32, #tpu.memory_space<vmem>>, vector<4x256xf32>,
    %c0_33 = arith.constant 0 : index
    %c18 = arith.constant 18 : index
    %51 = vector.load %arg7[%c0_33, %c18] : memref<4x290xf32, #tpu.memory_space<vmem>>, vector<4x256xf32>
    %cst_34 = arith.constant 0.000000e+00 : f32
    %52 = vector.broadcast %cst_34 : f32 to vector<4x256xf32>
    %53 = arith.select %26, %51, %52 : vector<4x256xi1>, vector<4x256xf32>
    %c20 = arith.constant 20 : index
    %c0_35 = arith.constant 0 : index
    %54 = vector.load %arg9[%c20, %c0_35] : memref<36x256xf32, #tpu.memory_space<vmem>>, vector<4x256xf32>
    tpu.vector_store %arg9[%c20, %c0_35], %53 {strides = array<i32>} : memref<36x256xf32, #tpu.memory_space<vmem>>, vector<4x256xf32>,
    %c0_36 = arith.constant 0 : index
    %c32 = arith.constant 32 : index
    %55 = vector.load %arg7[%c0_36, %c32] : memref<4x290xf32, #tpu.memory_space<vmem>>, vector<4x256xf32>
    %cst_37 = arith.constant 0.000000e+00 : f32
    %56 = vector.broadcast %cst_37 : f32 to vector<4x256xf32>
    %57 = arith.select %21, %55, %56 : vector<4x256xi1>, vector<4x256xf32>
    %c24 = arith.constant 24 : index
    %c0_38 = arith.constant 0 : index
    %58 = vector.load %arg9[%c24, %c0_38] : memref<36x256xf32, #tpu.memory_space<vmem>>, vector<4x256xf32>
    tpu.vector_store %arg9[%c24, %c0_38], %57 {strides = array<i32>} : memref<36x256xf32, #tpu.memory_space<vmem>>, vector<4x256xf32>,
    %c0_39 = arith.constant 0 : index
    %c33 = arith.constant 33 : index
    %59 = vector.load %arg7[%c0_39, %c33] : memref<4x290xf32, #tpu.memory_space<vmem>>, vector<4x256xf32>
    %c28 = arith.constant 28 : index
    %c0_40 = arith.constant 0 : index
    %60 = vector.load %arg9[%c28, %c0_40] : memref<36x256xf32, #tpu.memory_space<vmem>>, vector<4x256xf32>
    tpu.vector_store %arg9[%c28, %c0_40], %59 {strides = array<i32>} : memref<36x256xf32, #tpu.memory_space<vmem>>, vector<4x256xf32>,
    %c0_41 = arith.constant 0 : index
    %c34 = arith.constant 34 : index
    %61 = vector.load %arg7[%c0_41, %c34] : memref<4x290xf32, #tpu.memory_space<vmem>>, vector<4x256xf32>
    %cst_42 = arith.constant 0.000000e+00 : f32
    %62 = vector.broadcast %cst_42 : f32 to vector<4x256xf32>
    %63 = arith.select %26, %61, %62 : vector<4x256xi1>, vector<4x256xf32>
    %c32_43 = arith.constant 32 : index
    %c0_44 = arith.constant 0 : index
    %64 = vector.load %arg9[%c32_43, %c0_44] : memref<36x256xf32, #tpu.memory_space<vmem>>, vector<4x256xf32>
    tpu.vector_store %arg9[%c32_43, %c0_44], %63 {strides = array<i32>} : memref<36x256xf32, #tpu.memory_space<vmem>>, vector<4x256xf32>,
    %c0_45 = arith.constant 0 : index
    %c0_46 = arith.constant 0 : index
    %65 = vector.load %arg2[%c0_45, %c0_46] : memref<4x36xf32, #tpu.memory_space<vmem>>, vector<4x36xf32>
    %c0_47 = arith.constant 0 : index
    %c0_48 = arith.constant 0 : index
    %66 = vector.load %arg9[%c0_47, %c0_48] : memref<36x256xf32, #tpu.memory_space<vmem>>, vector<36x256xf32>
    %cst_49 = arith.constant dense<0.000000e+00> : vector<4x256xf32>
    %67 = tpu.matmul %65, %66, %cst_49 {dimension_numbers = #tpu.dot_dimension_numbers<[1], [0], [0], [1], [0, 0, 1, 1], [], []>} : vector<4x36xf32>, vector<36x256xf32>, vector<4x256xf32> -> vector<4x256xf32>
    %c0_50 = arith.constant 0 : index
    %c0_51 = arith.constant 0 : index
    %68 = vector.load %arg3[%c0_50, %c0_51] : memref<4x1xf32, #tpu.memory_space<vmem>>, vector<4x1xf32>
    %69 = vector.broadcast %68 : vector<4x1xf32> to vector<4x256xf32>
    %70 = arith.addf %67, %69 : vector<4x256xf32>
    %cst_52 = arith.constant 0.000000e+00 : f32
    %71 = vector.broadcast %cst_52 : f32 to vector<4x256xf32>
    %72 = arith.maximumf %70, %71 : vector<4x256xf32>
    %c0_53 = arith.constant 0 : index
    %c17_54 = arith.constant 17 : index
    %73 = vector.load %arg8[%c0_53, %c17_54] : memref<4x290xf32, #tpu.memory_space<vmem>>, vector<4x256xf32>
    tpu.vector_store %arg8[%c0_53, %c17_54], %72 {strides = array<i32>} : memref<4x290xf32, #tpu.memory_space<vmem>>, vector<4x256xf32>,
    %c0_55 = arith.constant 0 : index
    %c0_56 = arith.constant 0 : index
    %74 = vector.load %arg8[%c0_55, %c0_56] : memref<4x290xf32, #tpu.memory_space<vmem>>, vector<4x256xf32>
    %cst_57 = arith.constant 0.000000e+00 : f32
    %75 = vector.broadcast %cst_57 : f32 to vector<4x256xf32>
    %76 = arith.select %21, %74, %75 : vector<4x256xi1>, vector<4x256xf32>
    %c0_58 = arith.constant 0 : index
    %c0_59 = arith.constant 0 : index
    %77 = vector.load %arg9[%c0_58, %c0_59] : memref<36x256xf32, #tpu.memory_space<vmem>>, vector<4x256xf32>
    tpu.vector_store %arg9[%c0_58, %c0_59], %76 {strides = array<i32>} : memref<36x256xf32, #tpu.memory_space<vmem>>, vector<4x256xf32>,
    %c0_60 = arith.constant 0 : index
    %c1_61 = arith.constant 1 : index
    %78 = vector.load %arg8[%c0_60, %c1_61] : memref<4x290xf32, #tpu.memory_space<vmem>>, vector<4x256xf32>
    %c4_62 = arith.constant 4 : index
    %c0_63 = arith.constant 0 : index
    %79 = vector.load %arg9[%c4_62, %c0_63] : memref<36x256xf32, #tpu.memory_space<vmem>>, vector<4x256xf32>
    tpu.vector_store %arg9[%c4_62, %c0_63], %78 {strides = array<i32>} : memref<36x256xf32, #tpu.memory_space<vmem>>, vector<4x256xf32>,
    %c0_64 = arith.constant 0 : index
    %c2_65 = arith.constant 2 : index
    %80 = vector.load %arg8[%c0_64, %c2_65] : memref<4x290xf32, #tpu.memory_space<vmem>>, vector<4x256xf32>
    %cst_66 = arith.constant 0.000000e+00 : f32
    %81 = vector.broadcast %cst_66 : f32 to vector<4x256xf32>
    %82 = arith.select %26, %80, %81 : vector<4x256xi1>, vector<4x256xf32>
    %c8_67 = arith.constant 8 : index
    %c0_68 = arith.constant 0 : index
    %83 = vector.load %arg9[%c8_67, %c0_68] : memref<36x256xf32, #tpu.memory_space<vmem>>, vector<4x256xf32>
    tpu.vector_store %arg9[%c8_67, %c0_68], %82 {strides = array<i32>} : memref<36x256xf32, #tpu.memory_space<vmem>>, vector<4x256xf32>,
    %c0_69 = arith.constant 0 : index
    %c16_70 = arith.constant 16 : index
    %84 = vector.load %arg8[%c0_69, %c16_70] : memref<4x290xf32, #tpu.memory_space<vmem>>, vector<4x256xf32>
    %cst_71 = arith.constant 0.000000e+00 : f32
    %85 = vector.broadcast %cst_71 : f32 to vector<4x256xf32>
    %86 = arith.select %21, %84, %85 : vector<4x256xi1>, vector<4x256xf32>
    %c12_72 = arith.constant 12 : index
    %c0_73 = arith.constant 0 : index
    %87 = vector.load %arg9[%c12_72, %c0_73] : memref<36x256xf32, #tpu.memory_space<vmem>>, vector<4x256xf32>
    tpu.vector_store %arg9[%c12_72, %c0_73], %86 {strides = array<i32>} : memref<36x256xf32, #tpu.memory_space<vmem>>, vector<4x256xf32>,
    %c0_74 = arith.constant 0 : index
    %c17_75 = arith.constant 17 : index
    %88 = vector.load %arg8[%c0_74, %c17_75] : memref<4x290xf32, #tpu.memory_space<vmem>>, vector<4x256xf32>
    %c16_76 = arith.constant 16 : index
    %c0_77 = arith.constant 0 : index
    %89 = vector.load %arg9[%c16_76, %c0_77] : memref<36x256xf32, #tpu.memory_space<vmem>>, vector<4x256xf32>
    tpu.vector_store %arg9[%c16_76, %c0_77], %88 {strides = array<i32>} : memref<36x256xf32, #tpu.memory_space<vmem>>, vector<4x256xf32>,
    %c0_78 = arith.constant 0 : index
    %c18_79 = arith.constant 18 : index
    %90 = vector.load %arg8[%c0_78, %c18_79] : memref<4x290xf32, #tpu.memory_space<vmem>>, vector<4x256xf32>
    %cst_80 = arith.constant 0.000000e+00 : f32
    %91 = vector.broadcast %cst_80 : f32 to vector<4x256xf32>
    %92 = arith.select %26, %90, %91 : vector<4x256xi1>, vector<4x256xf32>
    %c20_81 = arith.constant 20 : index
    %c0_82 = arith.constant 0 : index
    %93 = vector.load %arg9[%c20_81, %c0_82] : memref<36x256xf32, #tpu.memory_space<vmem>>, vector<4x256xf32>
    tpu.vector_store %arg9[%c20_81, %c0_82], %92 {strides = array<i32>} : memref<36x256xf32, #tpu.memory_space<vmem>>, vector<4x256xf32>,
    %c0_83 = arith.constant 0 : index
    %c32_84 = arith.constant 32 : index
    %94 = vector.load %arg8[%c0_83, %c32_84] : memref<4x290xf32, #tpu.memory_space<vmem>>, vector<4x256xf32>
    %cst_85 = arith.constant 0.000000e+00 : f32
    %95 = vector.broadcast %cst_85 : f32 to vector<4x256xf32>
    %96 = arith.select %21, %94, %95 : vector<4x256xi1>, vector<4x256xf32>
    %c24_86 = arith.constant 24 : index
    %c0_87 = arith.constant 0 : index
    %97 = vector.load %arg9[%c24_86, %c0_87] : memref<36x256xf32, #tpu.memory_space<vmem>>, vector<4x256xf32>
    tpu.vector_store %arg9[%c24_86, %c0_87], %96 {strides = array<i32>} : memref<36x256xf32, #tpu.memory_space<vmem>>, vector<4x256xf32>,
    %c0_88 = arith.constant 0 : index
    %c33_89 = arith.constant 33 : index
    %98 = vector.load %arg8[%c0_88, %c33_89] : memref<4x290xf32, #tpu.memory_space<vmem>>, vector<4x256xf32>
    %c28_90 = arith.constant 28 : index
    %c0_91 = arith.constant 0 : index
    %99 = vector.load %arg9[%c28_90, %c0_91] : memref<36x256xf32, #tpu.memory_space<vmem>>, vector<4x256xf32>
    tpu.vector_store %arg9[%c28_90, %c0_91], %98 {strides = array<i32>} : memref<36x256xf32, #tpu.memory_space<vmem>>, vector<4x256xf32>,
    %c0_92 = arith.constant 0 : index
    %c34_93 = arith.constant 34 : index
    %100 = vector.load %arg8[%c0_92, %c34_93] : memref<4x290xf32, #tpu.memory_space<vmem>>, vector<4x256xf32>
    %cst_94 = arith.constant 0.000000e+00 : f32
    %101 = vector.broadcast %cst_94 : f32 to vector<4x256xf32>
    %102 = arith.select %26, %100, %101 : vector<4x256xi1>, vector<4x256xf32>
    %c32_95 = arith.constant 32 : index
    %c0_96 = arith.constant 0 : index
    %103 = vector.load %arg9[%c32_95, %c0_96] : memref<36x256xf32, #tpu.memory_space<vmem>>, vector<4x256xf32>
    tpu.vector_store %arg9[%c32_95, %c0_96], %102 {strides = array<i32>} : memref<36x256xf32, #tpu.memory_space<vmem>>, vector<4x256xf32>,
    %c0_97 = arith.constant 0 : index
    %c0_98 = arith.constant 0 : index
    %104 = vector.load %arg4[%c0_97, %c0_98] : memref<4x36xf32, #tpu.memory_space<vmem>>, vector<4x36xf32>
    %c0_99 = arith.constant 0 : index
    %c0_100 = arith.constant 0 : index
    %105 = vector.load %arg9[%c0_99, %c0_100] : memref<36x256xf32, #tpu.memory_space<vmem>>, vector<36x256xf32>
    %cst_101 = arith.constant dense<0.000000e+00> : vector<4x256xf32>
    %106 = tpu.matmul %104, %105, %cst_101 {dimension_numbers = #tpu.dot_dimension_numbers<[1], [0], [0], [1], [0, 0, 1, 1], [], []>} : vector<4x36xf32>, vector<36x256xf32>, vector<4x256xf32> -> vector<4x256xf32>
    %c0_102 = arith.constant 0 : index
    %c0_103 = arith.constant 0 : index
    %107 = vector.load %arg5[%c0_102, %c0_103] : memref<4x1xf32, #tpu.memory_space<vmem>>, vector<4x1xf32>
    %108 = vector.broadcast %107 : vector<4x1xf32> to vector<4x256xf32>
    %109 = arith.addf %106, %108 : vector<4x256xf32>
    %cst_104 = arith.constant 1.000000e+00 : f32
    %110 = vector.broadcast %cst_104 : f32 to vector<4x256xf32>
    %111 = arith.mulf %109, %110 : vector<4x256xf32>
    %112 = arith.addf %111, %33 : vector<4x256xf32>
    %cst_105 = arith.constant 0.000000e+00 : f32
    %113 = vector.broadcast %cst_105 : f32 to vector<4x256xf32>
    %114 = arith.maximumf %112, %113 : vector<4x256xf32>
    %115 = vector.shape_cast %114 : vector<4x256xf32> to vector<1x4x256xf32>
    %c0_106 = arith.constant 0 : index
    %c0_107 = arith.constant 0 : index
    %c0_108 = arith.constant 0 : index
    %116 = vector.load %arg6[%c0_106, %c0_107, %c0_108] : memref<1x4x256xf32, #tpu.memory_space<vmem>>, vector<1x4x256xf32>
    tpu.vector_store %arg6[%c0_106, %c0_107, %c0_108], %115 {strides = array<i32>} : memref<1x4x256xf32, #tpu.memory_space<vmem>>, vector<1x4x256xf32>,
    return
  }
  func.func @transform_0(%arg0: i32) -> (i32, i32, i32) {
    %c0_i32 = arith.constant 0 : i32
    %c0_i32_0 = arith.constant 0 : i32
    %c0_i32_1 = arith.constant 0 : i32
    return %arg0, %c0_i32, %c0_i32_0 : i32, i32, i32
  }
  func.func @transform_1(%arg0: i32) -> (i32, i32) {
    %c0_i32 = arith.constant 0 : i32
    %c0_i32_0 = arith.constant 0 : i32
    %c0_i32_1 = arith.constant 0 : i32
    return %c0_i32, %c0_i32_0 : i32, i32
  }
  func.func @transform_2(%arg0: i32) -> (i32, i32) {
    %c0_i32 = arith.constant 0 : i32
    %c0_i32_0 = arith.constant 0 : i32
    %c0_i32_1 = arith.constant 0 : i32
    return %c0_i32, %c0_i32_0 : i32, i32
  }
  func.func @transform_3(%arg0: i32) -> (i32, i32) {
    %c0_i32 = arith.constant 0 : i32
    %c0_i32_0 = arith.constant 0 : i32
    %c0_i32_1 = arith.constant 0 : i32
    return %c0_i32, %c0_i32_0 : i32, i32
  }
  func.func @transform_4(%arg0: i32) -> (i32, i32) {
    %c0_i32 = arith.constant 0 : i32
    %c0_i32_0 = arith.constant 0 : i32
    %c0_i32_1 = arith.constant 0 : i32
    return %c0_i32, %c0_i32_0 : i32, i32
  }
  func.func @transform_5(%arg0: i32) -> (i32, i32, i32) {
    %c0_i32 = arith.constant 0 : i32
    %c0_i32_0 = arith.constant 0 : i32
    %c0_i32_1 = arith.constant 0 : i32
    return %arg0, %c0_i32, %c0_i32_0 : i32, i32, i32
  }
}

</mosaic_0001>

<bundles_post_ra>
// kernel: tpu_custom_call.1
= control target key start
LH: loop header
LB: loop body
LE: loop exit
PB: predicated region body
PF: predicated region fallthrough
CT: control target
= control target key end

     0   :  { %10 = vsyncpa [#allocation6], 0  ;;  %s1567_s0 = inlined_call_operand.hbm [shape: f32[2,4,256], index: 0, kind: input, shape index: {}]   ;;  %s1568_s1 = inlined_call_operand.vmem [shape: f32[4,36], index: 1, kind: input, shape index: {}]   ;;  %s1569_s2 = inlined_call_operand.vmem [shape: f32[4,1], index: 2, kind: input, shape index: {}]   ;;  %s1570_s3 = inlined_call_operand.vmem [shape: f32[4,36], index: 3, kind: input, shape index: {}]   ;;  %s1571_s4 = inlined_call_operand.vmem [shape: f32[4,1], index: 4, kind: input, shape index: {}]   ;;  %s1572_s5 = inlined_call_operand.hbm [shape: f32[2,4,256], index: 5, kind: output, shape index: {}]  }
   0x1   :  { %12 = vsyncpa [#allocation6 + $0x1], 0 }
   0x2   :  { %13 = vsyncpa [#allocation7], 0 }
   0x3   :  { %15 = vsyncpa [#allocation7 + $0x1], 0  ;;  %s1196_s18 = smov 0   ;;  %s1198_s19 = smov 0  }
   0x4   :  { %s1200_s20 = smov 0   ;;  %s1202_s21 = smov 0  }
   0x5 LB: > { %s1217_s22 = sadd.s32 4294967295, %s1151_s21   ;;  %s949_s23 = sadd.s32 4294967294, %s1151_s21   ;;  %s1151_s21 = sphi %s1202_s21, %s1600_s21   ;;  %s1147_s20 = sphi %s1200_s20, %s1599_s20   ;;  %s1143_s19 = sphi %s1198_s19, %s1598_s19   ;;  %s1139_s18 = sphi %s1196_s18, %s1597_s18  }
   0x6   : > { %s1221_s24 = sadd.s32 1, %s1151_s21   ;;  %s28_s25 = sadd.s32 1, %s1147_s20 }
   0x7   : > { %s25_s26 = ssub.s32 %s1151_s21, %s1221_s24  ;;  %p35_p0 = scmp.ne.s32.totalorder %s1147_s20, %s1143_s19 }
   0x8   : > { %p26_p1 = scmp.eq.s32.totalorder %s25_s26, 0  ;;  %p36_p2 = scmp.eq.s32.totalorder %s1151_s21, 0 }
   0x9   : > { %p41_p3 = scmp.ne.s32.totalorder %s1143_s19, %s1139_s18  ;;  %p42_p4 = scmp.eq.s32.totalorder %s1217_s22, 0 }
   0xa   : > { %s1233_s27 = scalar_select %p26_p1, %s1147_s20, %s28_s25  }
   0xb   : > { %p1235_p5 = por %p36_p2, %p35_p0  ;;  %p1239_p6 = por %p42_p4, %p41_p3 }
   0xc   : > { %p149_p7 = scmp.eq.s32.totalorder %s1217_s22, 1  ;;  %p155_p8 = scmp.eq.s32.totalorder %s949_s23, 1 }
   0xd   : > { %p999_p10 = scmp.lt.s32.totalorder %s1151_s21, 2  ;;  %s187_s7 = sand.u32 1, %s1147_s20  }
   0xe   : > { %p1246_p11 = por %p149_p7, %p35_p0  ;;  %p1250_p12 = por %p155_p8, %p41_p3 }
   0xf   : > { %s969_s8 = sshll.u32 %s1151_s21, 7  ;;  %s952_s9 = sshll.u32 %s187_s7, 3 }
  0x10   : > { %s1577_s30 = scalar_select %p1246_p11, 1, 0 }
  0x11   : > { %s1578_s6 = scalar_select %p1250_p12, 1, 0 }
  0x12   : > { %s1259_s12 = scalar_lea.hbm %s1567_s0, %s969_s8  ;;  %s191_s13 = scalar_lea.vmem [#allocation5], %s952_s9 }
  0x13   : > { %s199_s14 = sshll.u32 %s191_s13, 4  ;;  %p1263_p13 = pnand %p999_p10, %p1235_p5  ;;  %s1267_s14 = int_to_ptr.vmem [resolvable:$true] %s199_s14 }
  0x14   : > { %s188_s16 = scalar_lea.sflag [#allocation6], %s187_s7  ;;  %s1055_s17 = scalar_lea.hbm %s1259_s12, 128 }
  0x15   : > { %p1056_p2 = scmp.ne.s32.totalorder %s1259_s12, %s1055_s17  ;;  %p1057_p3 = pneg %p1263_p13 }
  0x16   : > { %s1060_s26 = scalar_lea.hbm %s1567_s0, 256  ;;  %p1061_p5 = scmp.lt.u32.totalorder %s1259_s12, %s1567_s0 }
  0x17   : > { %p1058_p4 = pnand %p1057_p3, %p1056_p2  ;;  %p1062_p8 = scmp.lt.u32.totalorder %s1060_s26, %s1055_s17 }
  0x18   : > { %p1064_p9 = scmp.lt.u32.totalorder %s1055_s17, %s1259_s12 }
  0x19   : > { %p1059_p7 = pneg %p1058_p4  ;;  %p1063_p10 = por %p1062_p8, %p1061_p5 }
  0x1b   : > { %p1065_p0 = por %p1064_p9, %p1063_p10 }
  0x1d   : > { %p1066_p1 = pnand %p1065_p0, %p1059_p7 }
  0x1f   : > { %1069 = shalt.err (!%p1066_p1)
}
  0x20   : > { %s1070_s7 = scalar_lea.vmem %s1267_s14, 128  ;;  %s1153_s9 = smov [#allocation5]  }
  0x21   : > { %p1071_p2 = scmp.ne.s32.totalorder %s1267_s14, %s1070_s7  ;;  %s1075_s10 = sshll.u32 %s1153_s9, 4  ;;  %s1076_s10 = int_to_ptr.vmem [resolvable:$false] %s1075_s10 }
  0x22   : > { %s1077_s11 = scalar_lea.vmem %s1076_s10, 256  ;;  %p1078_p11 = scmp.lt.s32.totalorder %s1267_s14, %s1076_s10 }
  0x23   : > { %p1073_p4 = pnand %p1071_p2, %p1057_p3  ;;  %p1079_p5 = scmp.lt.s32.totalorder %s1077_s11, %s1070_s7 }
  0x25   : > { %p1074_p12 = pneg %p1073_p4  ;;  %p1080_p8 = por %p1079_p5, %p1078_p11 }
  0x27   : > { %p1081_p9 = pnand %p1080_p8, %p1074_p12 }
  0x29   : > { %1084 = shalt.err (!%p1081_p9)
}
  0x2a   : > { %994 = dma.hbm_to_vmem [thread:$0]  (!%p1263_p13), %s1259_s12, 128, %s1267_s14, %s188_s16  }
  0x2b   : > { %p1580_p0 = scmp.lt.s32.totalorder %s1151_s21, 3  ;;  %p1581_p1 = scmp.ge.s32.totalorder %s1151_s21, 1 }
  0x2d   : > { %p205_p3 = pnand %p1581_p1, %p1580_p0 }
  0x2e   : > { %s1301_s13 = sand.u32 (!%p205_p3), 1, %s1143_s19  }
  0x2f   : > { %208 = sbr.rel (%p205_p3) target bundleno = 1105 (0x451), region = 40  ;;  %s956_s17 = sshll.u32 (!%p205_p3), %s1301_s13, 3 }
  0x30   : > { %s211_s23 = scalar_lea.sflag (!%p205_p3), [#allocation6], %s1301_s13  ;;  %s214_s15 = scalar_lea.vmem (!%p205_p3), [#allocation5], %s956_s17 }
  0x36   : > { %1130 = dma.done.wait (%p1239_p6), %s211_s23, 128  }
  0x37   : > { %1132 = vsyncadd (%p1239_p6), %s211_s23, 4294967168  ;;  %vm280_vm0 = vcmask 134144   ;;  %vm282_vm1 = vcmask 273544   ;;  %v1154_v0 = vmov 0.0   ;;  %v1313_v1 = vld [vmem:[%s214_s15] sm:$0xff]  ;;  %s1155_s12 = smov 17   ;;  %v241_v2 = vlaneseq }
  0x38   : > { %281 = vst.msk [vmem:[#allocation2] sm:$0xf] %vm280_vm0, %v1154_v0  ;;  %284 = vst.msk [vmem:[#allocation3] sm:$0xf] %vm280_vm0, %v1154_v0  ;;  %568 = vmatprep.mubr.f32.mxu0 %v1154_v0  ;;  %846 = vmatprep.mubr.f32.mxu1 %v1154_v0  ;;  %vm295_vm2 = vcmask 1043592   ;;  %vm296_vm3 = vcmask 1047556   ;;  %v853_v51 = vcombine.high %v1313_v1, %v1313_v1 }
  0x39   : > { %283 = vst.msk [vmem:[#allocation2 + $0x8] sm:$0xf] %vm282_vm1, %v1154_v0  ;;  %285 = vst.msk [vmem:[#allocation3 + $0x8] sm:$0xf] %vm282_vm1, %v1154_v0  ;;  %288 = vrot.lane.b32.xlu0 %v1313_v1, %s1155_s12  ;;  %v1317_v3 = vand.u32 127, %v241_v2  ;;  %vm291_vm4 = vcmask 138240  }
  0x3a   : > { %vm1319_vm5 = vmor %vm296_vm3, %vm295_vm2  ;;  %s1156_s29 = smov 96   ;;  %s1157_s14 = smov 112   ;;  %v1164_v26 = vmov 0   ;;  %v487_v27 = vld [vmem:[%s1569_s2] sm:$0xf]  ;;  %vm320_vm8 = vcmask 1039360  }
  0x3b   : > { %v1326_v8 = vadd.s32 128, %v1317_v3  ;;  %v248_v9 = vand.u32 15, %v1317_v3  ;;  %s1158_s16 = smov 111   ;;  %s1159_s25 = smov 126   ;;  %1044 = vset.pattern.permute.xlu1 %v1164_v26  ;;  %1045 = vset.pattern.permute.xlu0 %v1164_v26  ;;  %vm449_vm9 = vcmask 777216   ;;  %vm358_vm10 = vcmask 916480  }
  0x3c   : > { %s1160_s26 = smov 110   ;;  %s1161_s28 = smov 127   ;;  %vm338_vm11 = vcmask 1031168   ;;  %vm402_vm14 = vcmask 900096   ;;  %vm428_vm15 = vcmask 785408   ;;  %vm384_vm1 = vcmask 908288  }
  0x3d   : > { %v255_v10 = vand.u32 15, %v1326_v8  ;;  %vm1334_vm6 = vcmp.ge.s32.totalorder %v248_v9, 1  ;;  %s1162_s8 = smov 95   ;;  %s1163_s7 = smov 94   ;;  %vm1390_vm12 = vcmp.lt.s32.totalorder %v248_v9, 15  ;;  %vm1574_vm2 = vcmask 769024  }
  0x3e   : > { %vm497_vm3 = vcmask 1043456   ;;  %v756_v50 = vld [vmem:[%s1570_s3] sm:$0xf]  ;;  %s865_s9 = scalar_lea.sflag [#allocation7], %s1301_s13  ;;  %p1594_p11 = scmp.ne.s32.totalorder %s1577_s30, 0 }
  0x3f   : > { %vm1342_vm7 = vcmp.ge.s32.totalorder %v255_v10, 1  ;;  %vm1396_vm13 = vcmp.lt.s32.totalorder %v255_v10, 15 }
  0xab   : > { %v289_v4 = vpop.permute.xlu0 %288 }
  0xac   : > { %v290_v6 = vrot.slane %v289_v4, 4 }
  0xae   : > { %v292_v7 = vsel %vm291_vm4, %v290_v6, %v289_v4  ;;  %299 = vst.msk [vmem:[#allocation2 + $0x8] sm:$0xf] %vm280_vm0, %v290_v6 }
  0xaf   : > { %298 = vst.msk [vmem:[#allocation2] sm:$0xff] %vm1319_vm5, %v292_v7 }
  0xb5   : > { %v418_v11 = vld [vmem:[#allocation2 + $0x8] sm:$0xf] }
  0xb6   : > { %v348_v12 = vld [vmem:[#allocation2 + $0x8] sm:$0xf]  ;;  %426 = vrot.lane.b32.xlu0 %v418_v11, %s1156_s29  ;;  %v308_v14 = vld [vmem:[#allocation2] sm:$0xff] }
  0xb7   : > { %356 = vrot.lane.b32.xlu1 %v348_v12, %s1157_s14  ;;  %v351_v16 = vcombine.high %v308_v14, %v308_v14  ;;  %v304_v17 = vsel %vm1334_vm6, %v308_v14, 0.0  ;;  %v374_v18 = vld [vmem:[#allocation2 + $0x8] sm:$0xf]  ;;  %v312_v24 = vcombine.low %v308_v14, %v308_v14 }
  0xb8   : > { %v328_v19 = vld [vmem:[#allocation2 + $0x8] sm:$0xf]  ;;  %306 = vst [vmem:[#allocation4] sm:$0xf] %v304_v17 }
  0xb9   : > { %v305_v20 = vsel %vm1342_vm7, %v351_v16, 0.0  ;;  %v392_v21 = vld [vmem:[#allocation2 + $0x8] sm:$0xf] }
  0xba   : > { %382 = vrot.lane.b32.xlu0 %v374_v18, %s1158_s16  ;;  %307 = vst [vmem:[#allocation4 + $0x8] sm:$0xf] %v305_v20  ;;  %v1049_v22 = vld [vmem:[#allocation2 + $0x8] ss:$0 sps:$4 sm:$0xff]  }
  0xbb   : > { %336 = vrot.lane.b32.xlu1 %v328_v19, %s1159_s25  ;;  %v1050_v23 = vld [vmem:[#allocation2 + $0x8] ss:$0 sps:$4 sm:$0xff]  }
  0xbc   : > { %v457_v25 = vld [vmem:[#allocation2 + $0x8] sm:$0xf] }
  0xbe   : > { %316 = vrot.lane.b32.xlu0 %v308_v14, %s1161_s28 }
  0xbf   : > { %400 = vrot.lane.b32.xlu1 %v392_v21, %s1160_s26 }
  0xc2   : > { %332 = vrot.lane.b32.xlu0 %v308_v14, %s1159_s25 }
  0xc3   : > { %352 = vrot.lane.b32.xlu1 %v308_v14, %s1157_s14 }
  0xc6   : > { %396 = vrot.lane.b32.xlu0 %v308_v14, %s1160_s26 }
  0xc7   : > { %422 = vrot.lane.b32.xlu1 %v308_v14, %s1156_s29 }
  0xca   : > { %445 = vrot.lane.b32.xlu0 %v308_v14, %s1162_s8 }
  0xcb   : > { %318 = vrot.lane.b32.xlu1 %v1049_v22, %s1161_s28 }
  0xce   : > { %354 = vrot.lane.b32.xlu0 %v351_v16, %s1157_s14 }
  0xcf   : > { %447 = vrot.lane.b32.xlu1 %v1050_v23, %s1162_s8 }
  0xd2   : > { %334 = vrot.lane.b32.xlu0 %v351_v16, %s1159_s25 }
  0xd3   : > { %314 = vrot.lane.b32.xlu1 %v312_v24, %s1161_s28 }
  0xd6   : > { %398 = vrot.lane.b32.xlu0 %v351_v16, %s1160_s26 }
  0xd7   : > { %424 = vrot.lane.b32.xlu1 %v351_v16, %s1156_s29 }
  0xda   : > { %378 = vrot.lane.b32.xlu0 %v308_v14, %s1158_s16 }
  0xdb   : > { %380 = vrot.lane.b32.xlu1 %v351_v16, %s1158_s16 }
  0xde   : > { %463 = vrot.lane.b32.xlu0 %v351_v16, %s1163_s7 }
  0xdf   : > { %443 = vrot.lane.b32.xlu1 %v312_v24, %s1162_s8 }
  0xe2   : > { %461 = vrot.lane.b32.xlu0 %v308_v14, %s1163_s7 }
  0xe3   : > { %465 = vrot.lane.b32.xlu1 %v457_v25, %s1163_s7 }
  0xe7   : > { %490 = vperm.xlu1 %1044, %v487_v27  }
 0x128   : > { %v427_v28 = vpop.permute.xlu0 %426 }
 0x129   : > { %v357_v29 = vpop.permute.xlu1 %356 }
 0x12c   : > { %v1375_v30 = vpop.permute.xlu0 %382 }
 0x12d   : > { %v337_v31 = vpop.permute.xlu1 %336 }
 0x130   : > { %v317_v33 = vpop.permute.xlu0 %316 }
 0x131   : > { %v401_v32 = vpop.permute.xlu1 %400 }
 0x134   : > { %v333_v35 = vpop.permute.xlu0 %332 }
 0x135   : > { %v353_v34 = vpop.permute.xlu1 %352 }
 0x138   : > { %v397_v37 = vpop.permute.xlu0 %396 }
 0x139   : > { %v423_v36 = vpop.permute.xlu1 %422 }
 0x13c   : > { %v1377_v39 = vpop.permute.xlu0 %445 }
 0x13d   : > { %v319_v38 = vpop.permute.xlu1 %318 }
 0x13e   : > { %v322_v40 = vsel %vm320_vm8, %v317_v33, %v319_v38 }
 0x13f   : > { %326 = vst [vmem:[#allocation4 + $0x8] sm:$0xf0] %v322_v40 }
 0x140   : > { %v355_v42 = vpop.permute.xlu0 %354 }
 0x141   : > { %v448_v41 = vpop.permute.xlu1 %447  ;;  %v359_v44 = vsel %vm358_vm10, %v353_v34, %v355_v42  ;;  %v360_v45 = vsel %vm358_vm10, %v355_v42, %v357_v29 }
 0x142   : > { %v451_v43 = vsel %vm449_vm9, %v1377_v39, %v448_v41  ;;  %v363_v46 = vsel %vm1334_vm6, %v359_v44, 0.0  ;;  %v364_v47 = vsel %vm1342_vm7, %v360_v45, 0.0 }
 0x143   : > { %455 = vst [vmem:[#allocation4 + $0x38] sm:$0xf0] %v451_v43  ;;  %v367_v48 = vrot.slane %v363_v46, 4  ;;  %v368_v49 = vrot.slane %v364_v47, 4 }
 0x144   : > { %v335_v52 = vpop.permute.xlu0 %334 }
 0x145   : > { %v315_v53 = vpop.permute.xlu1 %314  ;;  %371 = vst [vmem:[#allocation4 + $0x10] sm:$0xf0] %v367_v48  ;;  %372 = vst [vmem:[#allocation4 + $0x18] sm:$0xf0] %v368_v49  ;;  %v339_v54 = vsel %vm338_vm11, %v333_v35, %v335_v52  ;;  %v340_v55 = vsel %vm338_vm11, %v335_v52, %v337_v31 }
 0x146   : > { %v321_v56 = vsel %vm320_vm8, %v315_v53, %v317_v33  ;;  %v343_v57 = vsel %vm1390_vm12, %v339_v54, 0.0  ;;  %v344_v58 = vsel %vm1396_vm13, %v340_v55, 0.0  ;;  %v478_v16 = vld [vmem:[#allocation4 + $0x8] sm:$0xff] }
 0x147   : > { %325 = vst [vmem:[#allocation4] sm:$0xf0] %v321_v56  ;;  %345 = vst [vmem:[#allocation4 + $0x10] sm:$0xf] %v343_v57 }
 0x148   : > { %346 = vst [vmem:[#allocation4 + $0x18] sm:$0xf] %v344_v58  ;;  %v399_v59 = vpop.permute.xlu0 %398 }
 0x149   : > { %v425_v60 = vpop.permute.xlu1 %424  ;;  %v403_v61 = vsel %vm402_vm14, %v397_v37, %v399_v59  ;;  %v404_v62 = vsel %vm402_vm14, %v399_v59, %v401_v32 }
 0x14a   : > { %v429_v63 = vsel %vm428_vm15, %v423_v36, %v425_v60  ;;  %v430_v0 = vsel %vm428_vm15, %v425_v60, %v427_v28  ;;  %v407_v2 = vsel %vm1390_vm12, %v403_v61, 0.0  ;;  %v408_v3 = vsel %vm1396_vm13, %v404_v62, 0.0  ;;  %v476_v36 = vld [vmem:[%s1568_s1] sm:$0xf] }
 0x14b   : > { %v433_v4 = vsel %vm1334_vm6, %v429_v63, 0.0  ;;  %v434_v6 = vsel %vm1342_vm7, %v430_v0, 0.0  ;;  %v411_v7 = vrot.slane %v407_v2, 4  ;;  %v412_v8 = vrot.slane %v408_v3, 4  ;;  %v767_v0 = vld [vmem:[%s1571_s4] sm:$0xf] }
 0x14c   : > { %435 = vst [vmem:[#allocation4 + $0x30] sm:$0xf] %v433_v4  ;;  %436 = vst [vmem:[#allocation4 + $0x38] sm:$0xf] %v434_v6  ;;  %v379_v9 = vpop.permute.xlu0 %378 }
 0x14d   : > { %v381_v10 = vpop.permute.xlu1 %380  ;;  %415 = vst [vmem:[#allocation4 + $0x20] sm:$0xf0] %v411_v7  ;;  %416 = vst [vmem:[#allocation4 + $0x28] sm:$0xf0] %v412_v8 }
 0x14e   : > { %v385_v11 = vsel %vm384_vm1, %v379_v9, %v381_v10  ;;  %v386_v12 = vsel %vm384_vm1, %v381_v10, %v1375_v30  ;;  %v477_v14 = vld [vmem:[#allocation4] sm:$0xff]  ;;  %v479_v18 = vld [vmem:[#allocation4 + $0x10] sm:$0xff] }
 0x14f   : > { %389 = vst [vmem:[#allocation4 + $0x20] sm:$0xf] %v385_v11  ;;  %390 = vst [vmem:[#allocation4 + $0x28] sm:$0xf] %v386_v12  ;;  %v480_v17 = vld [vmem:[#allocation4 + $0x18] sm:$0xff]  ;;  %v973_v20 = vpack.c.bf16 %v479_v18, %v477_v14 }
 0x150   : > { %v971_v19 = vpack.c.bf16 %v480_v17, %v478_v16  ;;  %v464_v21 = vpop.permute.xlu0 %463 }
 0x151   : > { %v444_v22 = vpop.permute.xlu1 %443 }
 0x152   : > { %v450_v23 = vsel %vm449_vm9, %v444_v22, %v1377_v39  ;;  %972 = vmatprep.subr.bf16.mxu0 %v971_v19 }
 0x153   : > { %454 = vst [vmem:[#allocation4 + $0x30] sm:$0xf0] %v450_v23  ;;  %974 = vmatpush1.bf16.msra.mxu0 %v973_v20  ;;  %v484_v29 = vld [vmem:[#allocation4 + $0x38] sm:$0xff] }
 0x154   : > { %v462_v24 = vpop.permute.xlu0 %461 }
 0x155   : > { %v466_v25 = vpop.permute.xlu1 %465  ;;  %v468_v26 = vsel %vm1574_vm2, %v462_v24, %v464_v21 }
 0x156   : > { %v469_v27 = vsel %vm1574_vm2, %v464_v21, %v466_v25  ;;  %v482_v28 = vld [vmem:[#allocation4 + $0x28] sm:$0xff]  ;;  %v472_v30 = vsel %vm1390_vm12, %v468_v26, 0.0  ;;  %v481_v33 = vld [vmem:[#allocation4 + $0x20] sm:$0xff]  ;;  %vm493_vm2 = vcmask 293888  }
 0x157   : > { %v473_v31 = vsel %vm1396_vm13, %v469_v27, 0.0  ;;  %v975_v32 = vpack.c.bf16 %v484_v29, %v482_v28  ;;  %474 = vst [vmem:[#allocation4 + $0x40] sm:$0xf] %v472_v30 }
 0x158   : > { %475 = vst [vmem:[#allocation4 + $0x48] sm:$0xf] %v473_v31 }
 0x159   : > { %976 = vmatprep.subr.bf16.mxu0 %v975_v32 }
 0x15a   : > { %v483_v34 = vld [vmem:[#allocation4 + $0x30] sm:$0xff] }
 0x15b   : > { %v977_v35 = vpack.c.bf16 %v483_v34, %v481_v33 }
 0x15d   : > { %978 = vmatpush1.bf16.msra.mxu0 %v977_v35 }
 0x15e   : > { %v485_v38 = vld [vmem:[#allocation4 + $0x40] sm:$0xf] }
 0x15f   : > { %v486_v37 = vld [vmem:[#allocation4 + $0x48] sm:$0xf] }
 0x160   : > { %958 = vmatprep.subr.msk.mxu0 %vm497_vm3, %v486_v37 }
 0x161   : > { %959 = vmatpush1.msk.msra.mxu0 %vm497_vm3, %v485_v38 }
 0x162   : > { %960 = vmatmul.mubr.msk.f32.vlgmr.msra.gmra.mrb[0].mxu0 %vm493_vm2, %v476_v36 }
 0x166   : > { %v491_v39 = vpop.permute.xlu1 %490 }
 0x235   : > { %v570_v40 = vpop.f32.mrb[0].mxu0 }
 0x236   : > { %v571_v41 = vadd.f32 %v570_v40, %v491_v39  ;;  %v572_v42 = vpop.f32.mrb[1].mxu0 }
 0x237   : > { %v573_v43 = vadd.f32 %v572_v42, %v491_v39 }
 0x238   : > { %v575_v44 = vmax.f32 %v571_v41, 0.0 }
 0x239   : > { %v576_v45 = vmax.f32 %v573_v43, 0.0 }
 0x23b   : > { %v579_v46 = vcombine.low %v575_v44, %v576_v45 }
 0x23d   : > { %580 = vrot.lane.b32.xlu0 %v579_v46, %s1155_s12 }
 0x2af   : > { %v581_v47 = vpop.permute.xlu0 %580 }
 0x2b0   : > { %v582_v48 = vrot.slane %v581_v47, 4 }
 0x2b2   : > { %v583_v49 = vsel %vm291_vm4, %v582_v48, %v581_v47  ;;  %587 = vst.msk [vmem:[#allocation3 + $0x8] sm:$0xf] %vm280_vm0, %v582_v48  ;;  %vm1592_vm0 = vcmask 769024  }
 0x2b3   : > { %586 = vst.msk [vmem:[#allocation3] sm:$0xff] %vm1319_vm5, %v583_v49  ;;  %vm1593_vm4 = vmmov %vm1592_vm0 }
 0x2b9   : > { %v634_v52 = vld [vmem:[#allocation3 + $0x8] sm:$0xf] }
 0x2ba   : > { %v615_v53 = vld [vmem:[#allocation3 + $0x8] sm:$0xf]  ;;  %v588_v54 = vld [vmem:[#allocation3] sm:$0xff]  ;;  %642 = vrot.lane.b32.xlu0 %v634_v52, %s1157_s14 }
 0x2bb   : > { %623 = vrot.lane.b32.xlu1 %v615_v53, %s1159_s25  ;;  %v590_v55 = vcombine.high %v588_v54, %v588_v54  ;;  %v592_v56 = vsel %vm1334_vm6, %v588_v54, 0.0  ;;  %v701_v57 = vld [vmem:[#allocation3 + $0x8] sm:$0xf]  ;;  %v600_v62 = vcombine.low %v588_v54, %v588_v54 }
 0x2bc   : > { %v676_v58 = vld [vmem:[#allocation3 + $0x8] sm:$0xf]  ;;  %594 = vst [vmem:[#allocation4] sm:$0xf] %v592_v56 }
 0x2bd   : > { %v593_v59 = vsel %vm1342_vm7, %v590_v55, 0.0  ;;  %v659_v5 = vld [vmem:[#allocation3 + $0x8] sm:$0xf] }
 0x2be   : > { %709 = vrot.lane.b32.xlu0 %v701_v57, %s1156_s29  ;;  %595 = vst [vmem:[#allocation4 + $0x8] sm:$0xf] %v593_v59  ;;  %v1053_v60 = vld [vmem:[#allocation3 + $0x8] ss:$0 sps:$4 sm:$0xff]  }
 0x2bf   : > { %684 = vrot.lane.b32.xlu1 %v676_v58, %s1160_s26  ;;  %v1054_v61 = vld [vmem:[#allocation3 + $0x8] ss:$0 sps:$4 sm:$0xff]  }
 0x2c0   : > { %v738_v63 = vld [vmem:[#allocation3 + $0x8] sm:$0xf] }
 0x2c2   : > { %667 = vrot.lane.b32.xlu0 %v659_v5, %s1158_s16 }
 0x2c3   : > { %638 = vrot.lane.b32.xlu1 %v588_v54, %s1157_s14 }
 0x2c6   : > { %604 = vrot.lane.b32.xlu0 %v588_v54, %s1161_s28 }
 0x2c7   : > { %705 = vrot.lane.b32.xlu1 %v588_v54, %s1156_s29 }
 0x2ca   : > { %619 = vrot.lane.b32.xlu0 %v588_v54, %s1159_s25 }
 0x2cb   : > { %606 = vrot.lane.b32.xlu1 %v1053_v60, %s1161_s28 }
 0x2ce   : > { %680 = vrot.lane.b32.xlu0 %v588_v54, %s1160_s26 }
 0x2cf   : > { %729 = vrot.lane.b32.xlu1 %v1054_v61, %s1162_s8 }
 0x2d2   : > { %727 = vrot.lane.b32.xlu0 %v588_v54, %s1162_s8 }
 0x2d3   : > { %640 = vrot.lane.b32.xlu1 %v590_v55, %s1157_s14 }
 0x2d6   : > { %621 = vrot.lane.b32.xlu0 %v590_v55, %s1159_s25  ;;  %s240_s25 = scalar_lea.vmem [#allocation8], %s956_s17 }
 0x2d7   : > { %602 = vrot.lane.b32.xlu1 %v600_v62, %s1161_s28 }
 0x2da   : > { %682 = vrot.lane.b32.xlu0 %v590_v55, %s1160_s26  ;;  %s879_s26 = sshll.u32 %s240_s25, 4  ;;  %s1525_s26 = int_to_ptr.vmem [resolvable:$true] %s879_s26 }
 0x2db   : > { %707 = vrot.lane.b32.xlu1 %v590_v55, %s1156_s29  ;;  %s1085_s10 = scalar_lea.vmem %s1525_s26, 128 }
 0x2dc   : > { %p1086_p6 = scmp.ne.s32.totalorder %s1525_s26, %s1085_s10 }
 0x2de   : > { %663 = vrot.lane.b32.xlu0 %v588_v54, %s1158_s16  ;;  %p1087_p12 = pnand %p1086_p6, %p1594_p11 }
 0x2df   : > { %665 = vrot.lane.b32.xlu1 %v590_v55, %s1158_s16  ;;  %s970_s16 = sshll.u32 %s1217_s22, 7  ;;  %s1165_s22 = smov [#allocation8]  }
 0x2e0   : > { %p1088_p13 = pneg %p1087_p12  ;;  %s1089_s17 = sshll.u32 %s1165_s22, 4  ;;  %s1090_s17 = int_to_ptr.vmem [resolvable:$false] %s1089_s17 }
 0x2e1   : > { %s1091_s11 = scalar_lea.vmem %s1090_s17, 256  ;;  %p1092_p7 = scmp.lt.s32.totalorder %s1525_s26, %s1090_s17 }
 0x2e2   : > { %744 = vrot.lane.b32.xlu0 %v590_v55, %s1163_s7  ;;  %p1093_p10 = scmp.lt.s32.totalorder %s1091_s11, %s1085_s10 }
 0x2e3   : > { %725 = vrot.lane.b32.xlu1 %v600_v62, %s1162_s8 }
 0x2e4   : > { %p1094_p2 = por %p1093_p10, %p1092_p7 }
 0x2e6   : > { %742 = vrot.lane.b32.xlu0 %v588_v54, %s1163_s7  ;;  %p1095_p4 = pnand %p1094_p2, %p1088_p13 }
 0x2e7   : > { %746 = vrot.lane.b32.xlu1 %v738_v63, %s1163_s7  ;;  %s1523_s7 = scalar_lea.hbm %s1572_s5, %s970_s16 }
 0x2eb   : > { %770 = vperm.xlu1 %1044, %v767_v0  }
 0x32c   : > { %v643_v2 = vpop.permute.xlu0 %642 }
 0x32d   : > { %v624_v3 = vpop.permute.xlu1 %623 }
 0x330   : > { %v710_v4 = vpop.permute.xlu0 %709 }
 0x331   : > { %v685_v6 = vpop.permute.xlu1 %684 }
 0x334   : > { %v668_v7 = vpop.permute.xlu0 %667 }
 0x335   : > { %v639_v8 = vpop.permute.xlu1 %638 }
 0x338   : > { %v605_v10 = vpop.permute.xlu0 %604 }
 0x339   : > { %v706_v9 = vpop.permute.xlu1 %705 }
 0x33c   : > { %v620_v12 = vpop.permute.xlu0 %619 }
 0x33d   : > { %v607_v11 = vpop.permute.xlu1 %606 }
 0x33e   : > { %v609_v14 = vsel %vm320_vm8, %v605_v10, %v607_v11 }
 0x33f   : > { %613 = vst [vmem:[#allocation4 + $0x8] sm:$0xf0] %v609_v14 }
 0x340   : > { %v681_v17 = vpop.permute.xlu0 %680 }
 0x341   : > { %v730_v16 = vpop.permute.xlu1 %729 }
 0x344   : > { %v728_v19 = vpop.permute.xlu0 %727 }
 0x345   : > { %v641_v18 = vpop.permute.xlu1 %640  ;;  %v732_v22 = vsel %vm449_vm9, %v728_v19, %v730_v16 }
 0x346   : > { %v644_v20 = vsel %vm358_vm10, %v639_v8, %v641_v18  ;;  %v645_v21 = vsel %vm358_vm10, %v641_v18, %v643_v2  ;;  %736 = vst [vmem:[#allocation4 + $0x38] sm:$0xf0] %v732_v22  ;;  %v758_v13 = vld [vmem:[#allocation4 + $0x8] sm:$0xff] }
 0x347   : > { %v648_v23 = vsel %vm1334_vm6, %v644_v20, 0.0  ;;  %v649_v24 = vsel %vm1342_vm7, %v645_v21, 0.0 }
 0x348   : > { %v652_v25 = vrot.slane %v648_v23, 4  ;;  %v653_v26 = vrot.slane %v649_v24, 4  ;;  %v622_v27 = vpop.permute.xlu0 %621 }
 0x349   : > { %v603_v28 = vpop.permute.xlu1 %602  ;;  %v625_v29 = vsel %vm338_vm11, %v620_v12, %v622_v27  ;;  %v626_v30 = vsel %vm338_vm11, %v622_v27, %v624_v3 }
 0x34a   : > { %656 = vst [vmem:[#allocation4 + $0x10] sm:$0xf0] %v652_v25  ;;  %657 = vst [vmem:[#allocation4 + $0x18] sm:$0xf0] %v653_v26  ;;  %v608_v31 = vsel %vm320_vm8, %v603_v28, %v605_v10  ;;  %v629_v32 = vsel %vm1390_vm12, %v625_v29, 0.0  ;;  %v630_v33 = vsel %vm1396_vm13, %v626_v30, 0.0 }
 0x34b   : > { %612 = vst [vmem:[#allocation4] sm:$0xf0] %v608_v31  ;;  %631 = vst [vmem:[#allocation4 + $0x10] sm:$0xf] %v629_v32 }
 0x34c   : > { %632 = vst [vmem:[#allocation4 + $0x18] sm:$0xf] %v630_v33  ;;  %v683_v34 = vpop.permute.xlu0 %682 }
 0x34d   : > { %v708_v35 = vpop.permute.xlu1 %707  ;;  %v686_v36 = vsel %vm402_vm14, %v681_v17, %v683_v34  ;;  %v687_v37 = vsel %vm402_vm14, %v683_v34, %v685_v6 }
 0x34e   : > { %v711_v38 = vsel %vm428_vm15, %v706_v9, %v708_v35  ;;  %v712_v39 = vsel %vm428_vm15, %v708_v35, %v710_v4  ;;  %v690_v40 = vsel %vm1390_vm12, %v686_v36, 0.0  ;;  %v691_v41 = vsel %vm1396_vm13, %v687_v37, 0.0 }
 0x34f   : > { %v715_v42 = vsel %vm1334_vm6, %v711_v38, 0.0  ;;  %v716_v43 = vsel %vm1342_vm7, %v712_v39, 0.0  ;;  %v694_v44 = vrot.slane %v690_v40, 4  ;;  %v695_v45 = vrot.slane %v691_v41, 4 }
 0x350   : > { %717 = vst [vmem:[#allocation4 + $0x30] sm:$0xf] %v715_v42  ;;  %718 = vst [vmem:[#allocation4 + $0x38] sm:$0xf] %v716_v43  ;;  %v664_v46 = vpop.permute.xlu0 %663 }
 0x351   : > { %v666_v47 = vpop.permute.xlu1 %665  ;;  %698 = vst [vmem:[#allocation4 + $0x20] sm:$0xf0] %v694_v44  ;;  %699 = vst [vmem:[#allocation4 + $0x28] sm:$0xf0] %v695_v45 }
 0x352   : > { %v669_v48 = vsel %vm384_vm1, %v664_v46, %v666_v47  ;;  %v670_v49 = vsel %vm384_vm1, %v666_v47, %v668_v7  ;;  %v757_v52 = vld [vmem:[#allocation4] sm:$0xff]  ;;  %v759_v54 = vld [vmem:[#allocation4 + $0x10] sm:$0xff] }
 0x353   : > { %673 = vst [vmem:[#allocation4 + $0x20] sm:$0xf] %v669_v48  ;;  %674 = vst [vmem:[#allocation4 + $0x28] sm:$0xf] %v670_v49  ;;  %v760_v53 = vld [vmem:[#allocation4 + $0x18] sm:$0xff]  ;;  %v981_v55 = vpack.c.bf16 %v759_v54, %v757_v52 }
 0x354   : > { %v979_v15 = vpack.c.bf16 %v760_v53, %v758_v13  ;;  %v745_v56 = vpop.permute.xlu0 %744 }
 0x355   : > { %v726_v57 = vpop.permute.xlu1 %725 }
 0x356   : > { %v731_v58 = vsel %vm449_vm9, %v726_v57, %v728_v19  ;;  %980 = vmatprep.subr.bf16.mxu1 %v979_v15 }
 0x357   : > { %735 = vst [vmem:[#allocation4 + $0x30] sm:$0xf0] %v731_v58  ;;  %982 = vmatpush1.bf16.msra.mxu1 %v981_v55  ;;  %v764_v63 = vld [vmem:[#allocation4 + $0x38] sm:$0xff] }
 0x358   : > { %v743_v59 = vpop.permute.xlu0 %742 }
 0x359   : > { %v747_v5 = vpop.permute.xlu1 %746  ;;  %v748_v60 = vsel %vm1592_vm0, %v743_v59, %v745_v56 }
 0x35a   : > { %v749_v61 = vsel %vm1593_vm4, %v745_v56, %v747_v5  ;;  %v762_v62 = vld [vmem:[#allocation4 + $0x28] sm:$0xff]  ;;  %v752_v0 = vsel %vm1390_vm12, %v748_v60, 0.0  ;;  %v761_v4 = vld [vmem:[#allocation4 + $0x20] sm:$0xff] }
 0x35b   : > { %v753_v2 = vsel %vm1396_vm13, %v749_v61, 0.0  ;;  %v983_v3 = vpack.c.bf16 %v764_v63, %v762_v62  ;;  %754 = vst [vmem:[#allocation4 + $0x40] sm:$0xf] %v752_v0 }
 0x35c   : > { %755 = vst [vmem:[#allocation4 + $0x48] sm:$0xf] %v753_v2 }
 0x35d   : > { %984 = vmatprep.subr.bf16.mxu1 %v983_v3 }
 0x35e   : > { %v763_v6 = vld [vmem:[#allocation4 + $0x30] sm:$0xff] }
 0x35f   : > { %v985_v7 = vpack.c.bf16 %v763_v6, %v761_v4 }
 0x361   : > { %986 = vmatpush1.bf16.msra.mxu1 %v985_v7 }
 0x362   : > { %v765_v9 = vld [vmem:[#allocation4 + $0x40] sm:$0xf] }
 0x363   : > { %v766_v8 = vld [vmem:[#allocation4 + $0x48] sm:$0xf] }
 0x364   : > { %961 = vmatprep.subr.msk.mxu1 %vm497_vm3, %v766_v8 }
 0x365   : > { %962 = vmatpush1.msk.msra.mxu1 %vm497_vm3, %v765_v9 }
 0x366   : > { %963 = vmatmul.mubr.msk.f32.vlgmr.msra.gmra.mrb[0].mxu1 %vm493_vm2, %v756_v50 }
 0x36a   : > { %v771_v10 = vpop.permute.xlu1 %770 }
 0x439   : > { %v848_v11 = vpop.f32.mrb[0].mxu1 }
 0x43a   : > { %v849_v12 = vadd.f32 %v848_v11, %v771_v10  ;;  %v850_v14 = vpop.f32.mrb[1].mxu1 }
 0x43b   : > { %v851_v16 = vadd.f32 %v850_v14, %v771_v10 }
 0x43c   : > { %v855_v17 = vadd.f32 %v849_v12, %v1313_v1 }
 0x43d   : > { %v856_v18 = vadd.f32 %v853_v51, %v851_v16 }
 0x43e   : > { %v857_v19 = vmax.f32 %v855_v17, 0.0 }
 0x43f   : > { %v858_v20 = vmax.f32 %v856_v18, 0.0 }
 0x441   : > { %v861_v21 = vcombine.low %v857_v19, %v858_v20 }
 0x443   : > { %863 = vst [vmem:[%s240_s25] sm:$0xff] %v861_v21 }
 0x444   : > { %1098 = shalt.err (!%p1095_p4)
}
 0x445   : > { %s1099_s13 = scalar_lea.hbm %s1523_s7, 128  ;;  %s1103_s12 = scalar_lea.hbm %s1572_s5, 256 }
 0x446   : > { %p1100_p5 = scmp.ne.s32.totalorder %s1523_s7, %s1099_s13  ;;  %p1104_p0 = scmp.lt.u32.totalorder %s1523_s7, %s1572_s5 }
 0x447   : > { %p1105_p1 = scmp.lt.u32.totalorder %s1103_s12, %s1099_s13  ;;  %p1107_p6 = scmp.lt.u32.totalorder %s1099_s13, %s1523_s7 }
 0x448   : > { %p1101_p8 = pnand %p1100_p5, %p1594_p11 }
 0x449   : > { %p1106_p3 = por %p1105_p1, %p1104_p0 }
 0x44a   : > { %p1102_p9 = pneg %p1101_p8 }
 0x44b   : > { %p1108_p12 = por %p1107_p6, %p1106_p3 }
 0x44d   : > { %p1109_p13 = pnand %p1108_p12, %p1102_p9 }
 0x44f   : > { %1112 = shalt.err (!%p1109_p13)
}
 0x450   : > { %989 = dma.vmem_to_hbm [thread:$0]  (%p1594_p11), %s1525_s26, 128, %s1523_s7, %s865_s9  }
 0x451 PF: > { %s891_s16 = sand.u32 1, %s1139_s18   ;;  %p1595_p7 = scmp.ne.s32.totalorder %s1578_s6, 0 }
 0x452   : > { %p1596_p10 = scmp.ge.s32.totalorder %s1151_s21, 2  ;;  %s892_s25 = scalar_lea.sflag [#allocation7], %s891_s16 }
 0x454   : > { %p996_p2 = pnand %p1596_p10, %p1595_p7 }
 0x456   : > { %1134 = dma.done.wait (!%p996_p2), %s892_s25, 128  }
 0x457   : > { %1136 = vsyncadd (!%p996_p2), %s892_s25, 4294967168  ;;  %p18_p4 = scmp.ge.s32.totalorder %s1221_s24, 4   ;;  %s1597_s18 = smov %s1143_s19 }
 0x458   : > { %s1598_s19 = smov %s1147_s20  ;;  %s1599_s20 = smov %s1233_s27 }
 0x459   : > { %s1600_s21 = smov %s1221_s24  ;;  %20 = sbr.rel (!%p18_p4) target bundleno = 5 (0x5), region = 85 }
 0x460   :  { %897 = vsyncpa [#allocation6], 1 }
 0x461   :  { %899 = vsyncpa [#allocation6 + $0x1], 1 }
 0x462   :  { %900 = vsyncpa [#allocation7], 1 }
 0x463   :  { %902 = vsyncpa [#allocation7 + $0x1], 1 }

</bundles_post_ra>
